<compile_context>
chip_gen: v6e
topology: v6e:2x2x1
jax: 0.10.0
libtpu: 0.0.40
codegen_flags: <defaults>
</compile_context>

<pallas_src>
import jax
import jax.numpy as jnp
from jax.experimental import pallas as pl
from jax.experimental.pallas import tpu as pltpu


def mlp_kernel(x_ref, w1_ref, b1_ref, w2_ref, b2_ref, o_ref):
    # fc1: bf16 x bf16 -> f32 MXU accumulate; bias + ReLU in f32 (VPU).
    h = jnp.dot(x_ref[...], w1_ref[...], preferred_element_type=jnp.float32)
    h = jnp.maximum(h + b1_ref[...], 0.0)            # b1 is (1, 128), broadcasts
    # fc2: re-cast activations to bf16 for a single-pass bf16 MXU matmul.
    o = jnp.dot(h.astype(jnp.bfloat16), w2_ref[...],
                preferred_element_type=jnp.float32)
    o = jnp.maximum(o + b2_ref[...], 0.0)             # b2 is (1, 64)
    o_ref[...] = o.astype(o_ref.dtype)


def _round_up(x, m):
    return (x + m - 1) // m * m


def _default_tb_max():
    # v7x: HBM is fast enough that the ~0.35us/step fixed cost shows; double the
    # tile (fits the 32 MiB scoped VMEM default). v5e/v6e: keep 1024 (v5e's
    # scoped default is only 16 MiB).
    try:
        kind = jax.devices()[0].device_kind.lower()
    except Exception:
        return 1024
    return 2048 if "v7" in kind else 1024


def single2_forward(x, w1, b1, w2, b2, *, tb_max=None):
    """x: [B, 784] f32; w1: [784, 128]; b1: [128]; w2: [128, 64]; b2: [64]."""
    B, K = x.shape
    H1 = w1.shape[1]                  # 128
    H2 = w2.shape[1]                  # 64
    if tb_max is None:
        tb_max = _default_tb_max()

    # Batch tile: always a multiple of 8 sublanes (robust to any tb_max), capped
    # at tb_max. No padding of B: the final partial block is handled by Pallas
    # (padded reads, masked writes) and rows are independent.
    tb = min(tb_max, _round_up(B, 8))
    tb = max(8, (tb // 8) * 8)
    grid = pl.cdiv(B, tb)

    # bf16 operands (largest single lever); biases stay f32 for the epilogue.
    xb = x.astype(jnp.bfloat16)
    w1b = w1.astype(jnp.bfloat16)
    w2b = w2.astype(jnp.bfloat16)
    b1_2d = b1.reshape(1, H1).astype(jnp.float32)
    b2_2d = b2.reshape(1, H2).astype(jnp.float32)

    cost = pl.CostEstimate(
        flops=2 * B * (K * H1 + H1 * H2),
        transcendentals=0,
        bytes_accessed=(B * K * 2                     # streamed x (bf16)
                        + K * H1 * 2 + H1 * H2 * 2    # weights (bf16)
                        + H1 * 4 + H2 * 4             # biases (f32)
                        + B * H2 * 4),                # output (f32)
    )

    def _call(single_buffer_weights):
        # Constant-index-map operands only need one VMEM buffer.
        wkw = dict(pipeline_mode=pl.Buffered(1)) if single_buffer_weights else {}
        return pl.pallas_call(
            mlp_kernel,
            out_shape=jax.ShapeDtypeStruct((B, H2), jnp.float32),
            grid_spec=pltpu.PrefetchScalarGridSpec(
                num_scalar_prefetch=0,
                grid=(grid,),
                in_specs=[
                    pl.BlockSpec((tb, K), lambda i: (i, 0)),              # streamed x
                    pl.BlockSpec((K, H1), lambda i: (0, 0), **wkw),       # resident w1
                    pl.BlockSpec((1, H1), lambda i: (0, 0), **wkw),       # resident b1
                    pl.BlockSpec((H1, H2), lambda i: (0, 0), **wkw),      # resident w2
                    pl.BlockSpec((1, H2), lambda i: (0, 0), **wkw),       # resident b2
                ],
                out_specs=pl.BlockSpec((tb, H2), lambda i: (i, 0)),
            ),
            compiler_params=pltpu.CompilerParams(
                dimension_semantics=("parallel",),     # megacore sharding on v7x
            ),
            cost_estimate=cost,
        )(xb, w1b, b1_2d, w2b, b2_2d)

    try:
        return _call(True)
    except Exception:
        # Fallback if this Pallas build rejects single-buffered constant blocks.
        return _call(False)


def init_params(key):
    # Deterministic init mimicking nn.Linear's U(-1/sqrt(fan_in), 1/sqrt(fan_in)).
    k1, k2, k3, k4 = jax.random.split(key, 4)
    lim1 = 1.0 / jnp.sqrt(784.0)
    lim2 = 1.0 / jnp.sqrt(128.0)
    # PyTorch stores weight as (out, in); we keep (in, out) so kernel uses x @ W.
    w1 = jax.random.uniform(k1, (784, 128), jnp.float32, -lim1, lim1)
    b1 = jax.random.uniform(k2, (128,), jnp.float32, -lim1, lim1)
    w2 = jax.random.uniform(k3, (128, 64), jnp.float32, -lim2, lim2)
    b2 = jax.random.uniform(k4, (64,), jnp.float32, -lim2, lim2)
    return w1, b1, w2, b2


def _ref_f32(x, w1, b1, w2, b2):
    h = jnp.maximum(x @ w1 + b1, 0.0)
    return jnp.maximum(h @ w2 + b2, 0.0)


def _ref_bf16(x, w1, b1, w2, b2):
    # Mirrors the kernel's mixed precision: bf16 operands, f32 accumulate/epilogue.
    h = jnp.dot(x.astype(jnp.bfloat16), w1.astype(jnp.bfloat16),
                preferred_element_type=jnp.float32)
    h = jnp.maximum(h + b1, 0.0)
    o = jnp.dot(h.astype(jnp.bfloat16), w2.astype(jnp.bfloat16),
                preferred_element_type=jnp.float32)
    return jnp.maximum(o + b2, 0.0)


if __name__ == "__main__":
    key = jax.random.PRNGKey(0)
    kx, kp, kx2 = jax.random.split(key, 3)
    w1, b1, w2, b2 = init_params(kp)

    # Small primary check (B=8 -> single tile, block == full array).
    B = 8
    x = jax.random.normal(kx, (B, 784), jnp.float32)
    out = jax.block_until_ready(single2_forward(x, w1, b1, w2, b2))
    assert out.shape == (B, 64)
    assert jnp.allclose(out, _ref_bf16(x, w1, b1, w2, b2), atol=1e-2, rtol=1e-2)
    assert jnp.allclose(out, _ref_f32(x, w1, b1, w2, b2), atol=5e-2, rtol=5e-2)

    # Multi-tile + ragged batch (B=200, tb=64 -> grid=4, last block partial,
    # no jnp.pad copy of x).
    B2 = 200
    x2 = jax.random.normal(kx2, (B2, 784), jnp.float32)
    out2 = jax.block_until_ready(single2_forward(x2, w1, b1, w2, b2, tb_max=64))
    assert out2.shape == (B2, 64)
    assert jnp.allclose(out2, _ref_bf16(x2, w1, b1, w2, b2), atol=1e-2, rtol=1e-2)
    assert jnp.allclose(out2, _ref_f32(x2, w1, b1, w2, b2), atol=5e-2, rtol=5e-2)

    print("KERNEL_OK")
</pallas_src>

<mosaic_0001>
module attributes {stable_mosaic.version = 11 : i64} {
  func.func @mlp_kernel(%arg0: i32, %arg1: memref<8x784xbf16, #tpu.memory_space<vmem>>, %arg2: memref<784x128xbf16, #tpu.memory_space<vmem>>, %arg3: memref<1x128xf32, #tpu.memory_space<vmem>>, %arg4: memref<128x64xbf16, #tpu.memory_space<vmem>>, %arg5: memref<1x64xf32, #tpu.memory_space<vmem>>, %arg6: memref<8x64xf32, #tpu.memory_space<vmem>>) attributes {dimension_semantics = [#tpu.dimension_semantics<parallel>], iteration_bounds = array<i64: 1>, scalar_prefetch = 0 : i64, scratch_operands = 0 : i64, tpu.core_type = #tpu.core_type<tc>, window_params = [{transform_indices = @transform_0, window_bounds = array<i64: 8, 784>}, {pipeline_mode = #tpu.pipeline_mode<synchronous>, transform_indices = @transform_1, window_bounds = array<i64: 784, 128>}, {pipeline_mode = #tpu.pipeline_mode<synchronous>, transform_indices = @transform_2, window_bounds = array<i64: 1, 128>}, {pipeline_mode = #tpu.pipeline_mode<synchronous>, transform_indices = @transform_3, window_bounds = array<i64: 128, 64>}, {pipeline_mode = #tpu.pipeline_mode<synchronous>, transform_indices = @transform_4, window_bounds = array<i64: 1, 64>}, {transform_indices = @transform_5, window_bounds = array<i64: 8, 64>}]} {
    %c0 = arith.constant 0 : index
    %c0_0 = arith.constant 0 : index
    %0 = vector.load %arg1[%c0, %c0_0] : memref<8x784xbf16, #tpu.memory_space<vmem>>, vector<8x784xbf16>
    %c0_1 = arith.constant 0 : index
    %c0_2 = arith.constant 0 : index
    %1 = vector.load %arg2[%c0_1, %c0_2] : memref<784x128xbf16, #tpu.memory_space<vmem>>, vector<784x128xbf16>
    %cst = arith.constant dense<0.000000e+00> : vector<8x128xf32>
    %2 = tpu.matmul %0, %1, %cst {dimension_numbers = #tpu.dot_dimension_numbers<[1], [0], [0], [1], [0, 0, 1, 1], [], []>} : vector<8x784xbf16>, vector<784x128xbf16>, vector<8x128xf32> -> vector<8x128xf32>
    %c0_3 = arith.constant 0 : index
    %c0_4 = arith.constant 0 : index
    %3 = vector.load %arg3[%c0_3, %c0_4] : memref<1x128xf32, #tpu.memory_space<vmem>>, vector<1x128xf32>
    %4 = vector.broadcast %3 : vector<1x128xf32> to vector<8x128xf32>
    %5 = arith.addf %2, %4 : vector<8x128xf32>
    %cst_5 = arith.constant 0.000000e+00 : f32
    %6 = vector.broadcast %cst_5 : f32 to vector<8x128xf32>
    %7 = arith.maximumf %5, %6 : vector<8x128xf32>
    %8 = arith.truncf %7 : vector<8x128xf32> to vector<8x128xbf16>
    %c0_6 = arith.constant 0 : index
    %c0_7 = arith.constant 0 : index
    %9 = vector.load %arg4[%c0_6, %c0_7] : memref<128x64xbf16, #tpu.memory_space<vmem>>, vector<128x64xbf16>
    %cst_8 = arith.constant dense<0.000000e+00> : vector<8x64xf32>
    %10 = tpu.matmul %8, %9, %cst_8 {dimension_numbers = #tpu.dot_dimension_numbers<[1], [0], [0], [1], [0, 0, 1, 1], [], []>} : vector<8x128xbf16>, vector<128x64xbf16>, vector<8x64xf32> -> vector<8x64xf32>
    %c0_9 = arith.constant 0 : index
    %c0_10 = arith.constant 0 : index
    %11 = vector.load %arg5[%c0_9, %c0_10] : memref<1x64xf32, #tpu.memory_space<vmem>>, vector<1x64xf32>
    %12 = vector.broadcast %11 : vector<1x64xf32> to vector<8x64xf32>
    %13 = arith.addf %10, %12 : vector<8x64xf32>
    %cst_11 = arith.constant 0.000000e+00 : f32
    %14 = vector.broadcast %cst_11 : f32 to vector<8x64xf32>
    %15 = arith.maximumf %13, %14 : vector<8x64xf32>
    %c0_12 = arith.constant 0 : index
    %c0_13 = arith.constant 0 : index
    %16 = vector.load %arg6[%c0_12, %c0_13] : memref<8x64xf32, #tpu.memory_space<vmem>>, vector<8x64xf32>
    tpu.vector_store %arg6[%c0_12, %c0_13], %15 {strides = array<i32>} : memref<8x64xf32, #tpu.memory_space<vmem>>, vector<8x64xf32>,
    return
  }
  func.func @transform_0(%arg0: i32) -> (i32, i32) {
    %c0_i32 = arith.constant 0 : i32
    %c0_i32_0 = arith.constant 0 : i32
    return %arg0, %c0_i32 : i32, i32
  }
  func.func @transform_1(%arg0: i32) -> (i32, i32) {
    %c0_i32 = arith.constant 0 : i32
    %c0_i32_0 = arith.constant 0 : i32
    %c0_i32_1 = arith.constant 0 : i32
    return %c0_i32, %c0_i32_0 : i32, i32
  }
  func.func @transform_2(%arg0: i32) -> (i32, i32) {
    %c0_i32 = arith.constant 0 : i32
    %c0_i32_0 = arith.constant 0 : i32
    %c0_i32_1 = arith.constant 0 : i32
    return %c0_i32, %c0_i32_0 : i32, i32
  }
  func.func @transform_3(%arg0: i32) -> (i32, i32) {
    %c0_i32 = arith.constant 0 : i32
    %c0_i32_0 = arith.constant 0 : i32
    %c0_i32_1 = arith.constant 0 : i32
    return %c0_i32, %c0_i32_0 : i32, i32
  }
  func.func @transform_4(%arg0: i32) -> (i32, i32) {
    %c0_i32 = arith.constant 0 : i32
    %c0_i32_0 = arith.constant 0 : i32
    %c0_i32_1 = arith.constant 0 : i32
    return %c0_i32, %c0_i32_0 : i32, i32
  }
  func.func @transform_5(%arg0: i32) -> (i32, i32) {
    %c0_i32 = arith.constant 0 : i32
    %c0_i32_0 = arith.constant 0 : i32
    return %arg0, %c0_i32 : i32, i32
  }
}

module attributes {stable_mosaic.version = 11 : i64} {
  func.func @mlp_kernel(%arg0: i32, %arg1: memref<8x784xbf16, #tpu.memory_space<vmem>>, %arg2: memref<784x128xbf16, #tpu.memory_space<vmem>>, %arg3: memref<1x128xf32, #tpu.memory_space<vmem>>, %arg4: memref<128x64xbf16, #tpu.memory_space<vmem>>, %arg5: memref<1x64xf32, #tpu.memory_space<vmem>>, %arg6: memref<8x64xf32, #tpu.memory_space<vmem>>) attributes {dimension_semantics = [#tpu.dimension_semantics<parallel>], iteration_bounds = array<i64: 1>, scalar_prefetch = 0 : i64, scratch_operands = 0 : i64, tpu.core_type = #tpu.core_type<tc>, window_params = [{transform_indices = @transform_0, window_bounds = array<i64: 8, 784>}, {pipeline_mode = #tpu.pipeline_mode<synchronous>, transform_indices = @transform_1, window_bounds = array<i64: 784, 128>}, {pipeline_mode = #tpu.pipeline_mode<synchronous>, transform_indices = @transform_2, window_bounds = array<i64: 1, 128>}, {pipeline_mode = #tpu.pipeline_mode<synchronous>, transform_indices = @transform_3, window_bounds = array<i64: 128, 64>}, {pipeline_mode = #tpu.pipeline_mode<synchronous>, transform_indices = @transform_4, window_bounds = array<i64: 1, 64>}, {transform_indices = @transform_5, window_bounds = array<i64: 8, 64>}]} {
    %c0 = arith.constant 0 : index
    %c0_0 = arith.constant 0 : index
    %0 = vector.load %arg1[%c0, %c0_0] : memref<8x784xbf16, #tpu.memory_space<vmem>>, vector<8x784xbf16>
    %c0_1 = arith.constant 0 : index
    %c0_2 = arith.constant 0 : index
    %1 = vector.load %arg2[%c0_1, %c0_2] : memref<784x128xbf16, #tpu.memory_space<vmem>>, vector<784x128xbf16>
    %cst = arith.constant dense<0.000000e+00> : vector<8x128xf32>
    %2 = tpu.matmul %0, %1, %cst {dimension_numbers = #tpu.dot_dimension_numbers<[1], [0], [0], [1], [0, 0, 1, 1], [], []>} : vector<8x784xbf16>, vector<784x128xbf16>, vector<8x128xf32> -> vector<8x128xf32>
    %c0_3 = arith.constant 0 : index
    %c0_4 = arith.constant 0 : index
    %3 = vector.load %arg3[%c0_3, %c0_4] : memref<1x128xf32, #tpu.memory_space<vmem>>, vector<1x128xf32>
    %4 = vector.broadcast %3 : vector<1x128xf32> to vector<8x128xf32>
    %5 = arith.addf %2, %4 : vector<8x128xf32>
    %cst_5 = arith.constant 0.000000e+00 : f32
    %6 = vector.broadcast %cst_5 : f32 to vector<8x128xf32>
    %7 = arith.maximumf %5, %6 : vector<8x128xf32>
    %8 = arith.truncf %7 : vector<8x128xf32> to vector<8x128xbf16>
    %c0_6 = arith.constant 0 : index
    %c0_7 = arith.constant 0 : index
    %9 = vector.load %arg4[%c0_6, %c0_7] : memref<128x64xbf16, #tpu.memory_space<vmem>>, vector<128x64xbf16>
    %cst_8 = arith.constant dense<0.000000e+00> : vector<8x64xf32>
    %10 = tpu.matmul %8, %9, %cst_8 {dimension_numbers = #tpu.dot_dimension_numbers<[1], [0], [0], [1], [0, 0, 1, 1], [], []>} : vector<8x128xbf16>, vector<128x64xbf16>, vector<8x64xf32> -> vector<8x64xf32>
    %c0_9 = arith.constant 0 : index
    %c0_10 = arith.constant 0 : index
    %11 = vector.load %arg5[%c0_9, %c0_10] : memref<1x64xf32, #tpu.memory_space<vmem>>, vector<1x64xf32>
    %12 = vector.broadcast %11 : vector<1x64xf32> to vector<8x64xf32>
    %13 = arith.addf %10, %12 : vector<8x64xf32>
    %cst_11 = arith.constant 0.000000e+00 : f32
    %14 = vector.broadcast %cst_11 : f32 to vector<8x64xf32>
    %15 = arith.maximumf %13, %14 : vector<8x64xf32>
    %c0_12 = arith.constant 0 : index
    %c0_13 = arith.constant 0 : index
    %16 = vector.load %arg6[%c0_12, %c0_13] : memref<8x64xf32, #tpu.memory_space<vmem>>, vector<8x64xf32>
    tpu.vector_store %arg6[%c0_12, %c0_13], %15 {strides = array<i32>} : memref<8x64xf32, #tpu.memory_space<vmem>>, vector<8x64xf32>,
    return
  }
  func.func @transform_0(%arg0: i32) -> (i32, i32) {
    %c0_i32 = arith.constant 0 : i32
    %c0_i32_0 = arith.constant 0 : i32
    return %arg0, %c0_i32 : i32, i32
  }
  func.func @transform_1(%arg0: i32) -> (i32, i32) {
    %c0_i32 = arith.constant 0 : i32
    %c0_i32_0 = arith.constant 0 : i32
    %c0_i32_1 = arith.constant 0 : i32
    return %c0_i32, %c0_i32_0 : i32, i32
  }
  func.func @transform_2(%arg0: i32) -> (i32, i32) {
    %c0_i32 = arith.constant 0 : i32
    %c0_i32_0 = arith.constant 0 : i32
    %c0_i32_1 = arith.constant 0 : i32
    return %c0_i32, %c0_i32_0 : i32, i32
  }
  func.func @transform_3(%arg0: i32) -> (i32, i32) {
    %c0_i32 = arith.constant 0 : i32
    %c0_i32_0 = arith.constant 0 : i32
    %c0_i32_1 = arith.constant 0 : i32
    return %c0_i32, %c0_i32_0 : i32, i32
  }
  func.func @transform_4(%arg0: i32) -> (i32, i32) {
    %c0_i32 = arith.constant 0 : i32
    %c0_i32_0 = arith.constant 0 : i32
    %c0_i32_1 = arith.constant 0 : i32
    return %c0_i32, %c0_i32_0 : i32, i32
  }
  func.func @transform_5(%arg0: i32) -> (i32, i32) {
    %c0_i32 = arith.constant 0 : i32
    %c0_i32_0 = arith.constant 0 : i32
    return %arg0, %c0_i32 : i32, i32
  }
}

</mosaic_0001>

<bundles_post_ra>
// kernel: tpu_custom_call.1
= control target key start
LH: loop header
LB: loop body
LE: loop exit
PB: predicated region body
PF: predicated region fallthrough
CT: control target
= control target key end

     0   :  { %10 = vsyncpa [#allocation3], 0  ;;  %s1128_s0 = inlined_call_operand.vmem [shape: bf16[8,784], index: 0, kind: input, shape index: {}]   ;;  %s1129_s1 = inlined_call_operand.hbm [shape: bf16[784,128], index: 1, kind: input, shape index: {}]   ;;  %s1130_s2 = inlined_call_operand.vmem [shape: f32[1,128], index: 2, kind: input, shape index: {}]   ;;  %s1131_s3 = inlined_call_operand.vmem [shape: bf16[128,64], index: 3, kind: input, shape index: {}]   ;;  %s1132_s4 = inlined_call_operand.vmem [shape: f32[1,64], index: 4, kind: input, shape index: {}]   ;;  %s1133_s5 = inlined_call_operand.hbm [shape: f32[8,64], index: 5, kind: output, shape index: {}]  }
   0x1   :  { %11 = vsyncpa [#allocation4], 0  ;;  %s1042_s18 = smov [#allocation2]  }
   0x2   :  { %s19_s19 = sshll.u32 %s1042_s18, 4  ;;  %s20_s19 = int_to_ptr.vmem [resolvable:$true] %s19_s19 }
   0x3   :  { %s1006_s20 = scalar_lea.vmem %s20_s19, 6272  ;;  %p1011_p1 = scmp.lt.s32.totalorder %s20_s19, %s20_s19 }
   0x4   :  { %p1007_p0 = scmp.ne.s32.totalorder %s20_s19, %s1006_s20  ;;  %p1012_p2 = scmp.lt.s32.totalorder %s1006_s20, %s1006_s20 }
   0x6   :  { %p1013_p3 = por %p1012_p2, %p1011_p1 }
   0x8   :  { %p1014_p4 = pnand %p1013_p3, %p1007_p0 }
   0xa   :  { %1017 = shalt.err (!%p1014_p4)
}
   0xb   :  { %s1043_s21 = smov 64   ;;  %s1044_s22 = smov 4  }
   0xc   :  { %25 = dma.hbm_to_vmem [thread:$0]  %s1129_s1, 6272, %s20_s19, [#allocation3], %s1043_s21, %s1043_s21, %s1044_s22  }
   0xd   :  { %1038 = dma.done.wait [#allocation3], 6272  }
   0xe   :  { %1039 = vsyncadd [#allocation3], 4294961024  ;;  %v934_v0 = vld [vmem:[#allocation2 + $0x78] sm:$0xff]   ;;  %v938_v4 = vld [vmem:[#allocation2 + $0x70] sm:$0xff]   ;;  %v1045_v43 = vmov 0.0   ;;  %vm1046_vm0 = vmmov 0  }
   0xf   :  { %v935_v1 = vld [vmem:[#allocation2 + $0x38] sm:$0xff]   ;;  %825 = vmatprep.subr.bf16.mxu0 %v934_v0  ;;  %v939_v5 = vld [vmem:[#allocation2 + $0x30] sm:$0xff]   ;;  %v942_v8 = vld [vmem:[#allocation2 + $0x68] sm:$0xff]   ;;  %vm463_vm1 = vcmask 130048   ;;  %s1047_s1 = smov [#allocation5]   ;;  %vm741_vm2 = vcmask 523264  }
  0x10   :  { %v936_v2 = vld [vmem:[#allocation2 + $0xf8] sm:$0xff]   ;;  %826 = vmatpush3.bf16.msra.mxu0 %v935_v1  ;;  %v940_v6 = vld [vmem:[#allocation2 + $0xf0] sm:$0xff]   ;;  %v943_v9 = vld [vmem:[#allocation2 + $0x28] sm:$0xff]  }
  0x11   :  { %v937_v3 = vld [vmem:[#allocation2 + $0xb8] sm:$0xff]   ;;  %847 = vmatprep.subr.bf16.mxu1 %v936_v2  ;;  %827 = vmatprep.subr.bf16.mxu0 %v938_v4  ;;  %v941_v7 = vld [vmem:[#allocation2 + $0xb0] sm:$0xff]   ;;  %v944_v10 = vld [vmem:[#allocation2 + $0xe8] sm:$0xff]  }
  0x12   :  { %848 = vmatpush3.bf16.msra.mxu1 %v937_v3  ;;  %v945_v11 = vld [vmem:[#allocation2 + $0xa8] sm:$0xff]   ;;  %v946_v12 = vld [vmem:[#allocation2 + $0x60] sm:$0xff]   ;;  %v950_v16 = vld [vmem:[#allocation2 + $0x58] sm:$0xff]  }
  0x13   :  { %849 = vmatprep.subr.bf16.mxu1 %v940_v6  ;;  %v947_v13 = vld [vmem:[#allocation2 + $0x20] sm:$0xff]   ;;  %v951_v17 = vld [vmem:[#allocation2 + $0x18] sm:$0xff]   ;;  %v954_v20 = vld [vmem:[#allocation2 + $0x50] sm:$0xff]  }
  0x14   :  { %828 = vmatpush3.bf16.msra.mxu0 %v939_v5  ;;  %v948_v14 = vld [vmem:[#allocation2 + $0xe0] sm:$0xff]   ;;  %v952_v18 = vld [vmem:[#allocation2 + $0xd8] sm:$0xff]   ;;  %v955_v21 = vld [vmem:[#allocation2 + $0x10] sm:$0xff]  }
  0x15   :  { %829 = vmatprep.subr.bf16.mxu0 %v942_v8  ;;  %v949_v15 = vld [vmem:[#allocation2 + $0xa0] sm:$0xff]   ;;  %v953_v19 = vld [vmem:[#allocation2 + $0x98] sm:$0xff]   ;;  %v956_v22 = vld [vmem:[#allocation2 + $0xd0] sm:$0xff]  }
  0x16   :  { %850 = vmatpush3.bf16.msra.mxu1 %v941_v7  ;;  %v957_v23 = vld [vmem:[#allocation2 + $0x90] sm:$0xff]   ;;  %v958_v24 = vld [vmem:[#allocation2 + $0x48] sm:$0xff]   ;;  %v962_v28 = vld [vmem:[#allocation2 + $0x40] sm:$0xff]  }
  0x17   :  { %851 = vmatprep.subr.bf16.mxu1 %v944_v10  ;;  %v959_v25 = vld [vmem:[#allocation2 + $0x8] sm:$0xff]   ;;  %v963_v29 = vld [vmem:[#allocation2] sm:$0xff]   ;;  %v968_v35 = vld [vmem:[#allocation2 + $0x178] sm:$0xff]  }
  0x18   :  { %830 = vmatpush3.bf16.msra.mxu0 %v943_v9  ;;  %v960_v26 = vld [vmem:[#allocation2 + $0xc8] sm:$0xff]   ;;  %v964_v30 = vld [vmem:[#allocation2 + $0xc0] sm:$0xff]   ;;  %v971_v39 = vld [vmem:[#allocation2 + $0x138] sm:$0xff]  }
  0x19   :  { %831 = vmatprep.subr.bf16.mxu0 %v946_v12  ;;  %v961_v27 = vld [vmem:[#allocation2 + $0x88] sm:$0xff]   ;;  %v36_v31 = vld [vmem:[%s1128_s0] sm:$0xff]  ;;  %v972_v40 = vld [vmem:[#allocation2 + $0x170] sm:$0xff]  }
  0x1a   :  { %852 = vmatpush3.bf16.msra.mxu1 %v945_v11  ;;  %v759_v32 = vcombine.low %v36_v31, %v36_v31  ;;  %v760_v33 = vcombine.high %v36_v31, %v36_v31  ;;  %v967_v34 = vld [vmem:[#allocation2 + $0x80] sm:$0xff]   ;;  %v37_v36 = vld [vmem:[%s1128_s0 + $0x8] sm:$0xff]  ;;  %v973_v41 = vld [vmem:[#allocation2 + $0x130] sm:$0xff]  }
  0x1b   :  { %853 = vmatprep.subr.bf16.mxu1 %v948_v14  ;;  %v761_v37 = vcombine.low %v37_v36, %v37_v36  ;;  %v762_v38 = vcombine.high %v37_v36, %v37_v36  ;;  %v974_v42 = vld [vmem:[#allocation2 + $0x168] sm:$0xff]   ;;  %v976_v45 = vld [vmem:[#allocation2 + $0x160] sm:$0xff]   ;;  %v978_v47 = vld [vmem:[#allocation2 + $0x158] sm:$0xff]  }
  0x1c   :  { %832 = vmatpush3.bf16.msra.mxu0 %v947_v13  ;;  %499 = vmatprep.mubr.bf16.mxu0 %v760_v33  ;;  %v975_v44 = vld [vmem:[#allocation2 + $0x128] sm:$0xff]   ;;  %v977_v46 = vld [vmem:[#allocation2 + $0x120] sm:$0xff]   ;;  %v979_v48 = vld [vmem:[#allocation2 + $0x118] sm:$0xff]  }
  0x1d   :  { %833 = vmatprep.subr.bf16.mxu0 %v950_v16  ;;  %539 = vmatprep.mubr.bf16.mxu1 %v762_v38  ;;  %v980_v49 = vld [vmem:[#allocation2 + $0x150] sm:$0xff]   ;;  %v986_v50 = vld [vmem:[#allocation2 + $0x180] sm:$0xff]   ;;  %v989_v54 = vld [vmem:[%s1128_s0 + $0x18] ss:$0 sps:$4 sm:$0xff]  }
  0x1e   :  { %854 = vmatpush3.bf16.msra.mxu1 %v949_v15  ;;  %v38_v51 = vld [vmem:[%s1128_s0 + $0x10] sm:$0xff]  ;;  %v982_v55 = vld [vmem:[#allocation2 + $0x148] sm:$0xff]   ;;  %v984_v57 = vld [vmem:[#allocation2 + $0x140] sm:$0xff]  }
  0x1f   :  { %855 = vmatprep.subr.bf16.mxu1 %v952_v18  ;;  %v981_v52 = vld [vmem:[#allocation2 + $0x110] sm:$0xff]   ;;  %v764_v53 = vcombine.high %v38_v51, %v38_v51  ;;  %v983_v56 = vld [vmem:[#allocation2 + $0x108] sm:$0xff]   ;;  %v985_v58 = vld [vmem:[#allocation2 + $0x100] sm:$0xff]   ;;  %v763_v59 = vcombine.low %v38_v51, %v38_v51 }
  0x20   :  { %834 = vmatpush3.bf16.msra.mxu0 %v951_v17  ;;  %v990_v60 = vld [vmem:[%s1131_s3 + $0x38] sm:$0xff]   ;;  %v991_v61 = vld [vmem:[%s1131_s3 + $0x30] sm:$0xff]   ;;  %v992_v62 = vld [vmem:[%s1131_s3 + $0x28] sm:$0xff]  }
  0x21   :  { %835 = vmatprep.subr.bf16.mxu0 %v954_v20  ;;  %v993_v63 = vld [vmem:[%s1131_s3 + $0x20] sm:$0xff]   ;;  %v994_v0 = vld [vmem:[%s1131_s3 + $0x18] sm:$0xff]   ;;  %v995_v1 = vld [vmem:[%s1131_s3 + $0x10] sm:$0xff]  }
  0x22   :  { %856 = vmatpush3.bf16.msra.mxu1 %v953_v19  ;;  %v996_v2 = vld [vmem:[%s1131_s3 + $0x8] sm:$0xff]   ;;  %v997_v3 = vld [vmem:[%s1131_s3] sm:$0xff]  }
  0x23   :  { %857 = vmatprep.subr.bf16.mxu1 %v956_v22  ;;  %v758_v17 = vld [vmem:[%s1130_s2] ss:$0 sm:$0xff]  ;;  %s749_s2 = sshll.u32 %s1047_s1, 4  ;;  %s750_s2 = int_to_ptr.vmem [resolvable:$true] %s749_s2 }
  0x24   :  { %836 = vmatpush3.bf16.msra.mxu0 %v955_v21  ;;  %s1018_s25 = scalar_lea.vmem %s750_s2, 128  ;;  %p1023_p6 = scmp.lt.s32.totalorder %s750_s2, %s750_s2 }
  0x25   :  { %837 = vmatprep.subr.bf16.mxu0 %v958_v24  ;;  %p1019_p5 = scmp.ne.s32.totalorder %s750_s2, %s1018_s25  ;;  %p1024_p7 = scmp.lt.s32.totalorder %s1018_s25, %s1018_s25 }
  0x26   :  { %858 = vmatpush3.bf16.msra.mxu1 %v957_v23 }
  0x27   :  { %859 = vmatprep.subr.bf16.mxu1 %v960_v26  ;;  %p1025_p8 = por %p1024_p7, %p1023_p6 }
  0x28   :  { %838 = vmatpush3.bf16.msra.mxu0 %v959_v25 }
  0x29   :  { %839 = vmatprep.subr.bf16.mxu0 %v962_v28  ;;  %p1026_p9 = pnand %p1025_p8, %p1019_p5 }
  0x2a   :  { %860 = vmatpush3.bf16.msra.mxu1 %v961_v27 }
  0x2b   :  { %861 = vmatprep.subr.bf16.mxu1 %v964_v30  ;;  %v816_v30 = vld [vmem:[%s1132_s4] ss:$0 sm:$0xff] }
  0x2c   :  { %840 = vmatpush3.bf16.msra.mxu0 %v963_v29 }
  0x2d   :  { %869 = vmatprep.subr.bf16.mxu0 %v968_v35 }
  0x2e   :  { %862 = vmatpush3.bf16.msra.mxu1 %v967_v34 }
  0x2f   :  { %500 = vmatmul.mubr.bf16.vlgmr.msra.gmra.mxu0 %v759_v32  ;;  %902 = vmatprep.subr.bf16.mxu1 %v1045_v43 }
  0x30   :  { %870 = vmatpush3.bf16.msra.mxu0 %v971_v39  ;;  %579 = vmatprep.mubr.bf16.mxu0 %v764_v53 }
  0x31   :  { %540 = vmatmul.mubr.bf16.vlgmr.msra.gmra.mxu1 %v761_v37  ;;  %871 = vmatprep.subr.bf16.mxu0 %v972_v40 }
  0x32   :  { %904 = vmatprep.mubr.msk.bf16.mxu1 %vm1046_vm0, %v1045_v43  ;;  %903 = vmatpush3.bf16.msra.mxu1 %v986_v50 }
  0x33   :  { %908 = vmatprep.subr.bf16.mxu1 %v1045_v43 }
  0x34   :  { %872 = vmatpush3.bf16.msra.mxu0 %v973_v41 }
  0x35   :  { %873 = vmatprep.subr.bf16.mxu0 %v974_v42 }
  0x38   :  { %874 = vmatpush3.bf16.msra.mxu0 %v975_v44 }
  0x39   :  { %875 = vmatprep.subr.bf16.mxu0 %v976_v45  ;;  %905 = vmatmul.mubr.msk.bf16.vlgmr.msra.gmra.mxu1 %vm463_vm1, %v989_v54 }
  0x3a   :  { %924 = vmatprep.mubr.msk.bf16.mxu1 %vm1046_vm0, %v1045_v43  ;;  %909 = vmatpush3.bf16.msra.mxu1 %v990_v60 }
  0x3b   :  { %910 = vmatprep.subr.bf16.mxu1 %v1045_v43 }
  0x3c   :  { %876 = vmatpush3.bf16.msra.mxu0 %v977_v46 }
  0x3d   :  { %877 = vmatprep.subr.bf16.mxu0 %v978_v47 }
  0x3e   :  { %911 = vmatpush3.bf16.msra.mxu1 %v991_v61 }
  0x3f   :  { %912 = vmatprep.subr.bf16.mxu1 %v1045_v43 }
  0x40   :  { %878 = vmatpush3.bf16.msra.mxu0 %v979_v48 }
  0x41   :  { %879 = vmatprep.subr.bf16.mxu0 %v980_v49 }
  0x42   :  { %913 = vmatpush3.bf16.msra.mxu1 %v992_v62 }
  0x43   :  { %914 = vmatprep.subr.bf16.mxu1 %v1045_v43 }
  0x44   :  { %880 = vmatpush3.bf16.msra.mxu0 %v981_v52 }
  0x45   :  { %881 = vmatprep.subr.bf16.mxu0 %v982_v55 }
  0x46   :  { %915 = vmatpush3.bf16.msra.mxu1 %v993_v63 }
  0x47   :  { %916 = vmatprep.subr.bf16.mxu1 %v1045_v43 }
  0x48   :  { %882 = vmatpush3.bf16.msra.mxu0 %v983_v56 }
  0x49   :  { %883 = vmatprep.subr.bf16.mxu0 %v984_v57 }
  0x4a   :  { %917 = vmatpush3.bf16.msra.mxu1 %v994_v0 }
  0x4b   :  { %918 = vmatprep.subr.bf16.mxu1 %v1045_v43 }
  0x4c   :  { %884 = vmatpush3.bf16.msra.mxu0 %v985_v58 }
  0x4e   :  { %919 = vmatpush3.bf16.msra.mxu1 %v995_v1 }
  0x4f   :  { %580 = vmatmul.mubr.bf16.vlgmr.msra.gmra.mxu0 %v763_v59  ;;  %920 = vmatprep.subr.bf16.mxu1 %v1045_v43 }
  0x52   :  { %921 = vmatpush3.bf16.msra.mxu1 %v996_v2 }
  0x53   :  { %922 = vmatprep.subr.bf16.mxu1 %v1045_v43 }
  0x56   :  { %923 = vmatpush3.bf16.msra.mxu1 %v997_v3 }
  0xef   :  { %v841_v4 = vpop.f32.mrf.mxu0 }
  0xf1   :  { %v842_v5 = vpop.f32.mrf.mxu0  ;;  %v863_v6 = vpop.f32.mrf.mxu1 }
  0xf2   :  { %v843_v16 = vadd.f32 %v842_v5, %v841_v4 }
  0xf3   :  { %v844_v7 = vpop.f32.mrf.mxu0  ;;  %v864_v8 = vpop.f32.mrf.mxu1 }
  0xf4   :  { %v502_v18 = vadd.f32 %v843_v16, %v758_v17  ;;  %v865_v19 = vadd.f32 %v864_v8, %v863_v6 }
  0xf5   :  { %v845_v9 = vpop.f32.mrf.mxu0  ;;  %v866_v10 = vpop.f32.mrf.mxu1 }
  0xf6   :  { %v542_v22 = vadd.f32 %v865_v19, %v502_v18 }
  0xf7   :  { %v867_v11 = vpop.f32.mrf.mxu1 }
  0xf9   :  { %v621_v12 = vpop.f32.mrf.mxu1 }
  0xfb   :  { %v906_v13 = vpop.f32.mrf.mxu1 }
  0xfd   :  { %v624_v14 = vpop.f32.mrf.mxu1 }
  0xff   :  { %v907_v15 = vpop.f32.mrf.mxu1 }
 0x10f   :  { %v885_v20 = vpop.f32.mrf.mxu0 }
 0x111   :  { %v886_v21 = vpop.f32.mrf.mxu0 }
 0x112   :  { %v887_v23 = vadd.f32 %v886_v21, %v885_v20 }
 0x113   :  { %v888_v24 = vpop.f32.mrf.mxu0 }
 0x114   :  { %v582_v25 = vadd.f32 %v887_v23, %v542_v22 }
 0x115   :  { %v889_v26 = vpop.f32.mrf.mxu0 }
 0x116   :  { %v622_v27 = vadd.f32 %v621_v12, %v582_v25 }
 0x118   :  { %v627_v28 = vmax.f32 %v622_v27, 0.0 }
 0x11a   :  { %v628_v29 = vpack.c.bf16 %v627_v28, %v627_v28 }
 0x11c   :  { %925 = vmatmul.mubr.bf16.vlgmr.msra.gmra.mxu1 %v628_v29 }
 0x1dc   :  { %v734_v31 = vpop.f32.mrf.mxu1 }
 0x1dd   :  { %v735_v32 = vadd.f32 %v816_v30, %v734_v31 }
 0x1de   :  { %v926_v33 = vpop.f32.mrf.mxu1 }
 0x1df   :  { %v740_v34 = vmax.f32 %v735_v32, 0.0 }
 0x1e0   :  { %v737_v35 = vpop.f32.mrf.mxu1 }
 0x1e1   :  { %742 = vst.msk [vmem:[#allocation5] sm:$0xff] %vm741_vm2, %v740_v34 }
 0x1e2   :  { %v927_v36 = vpop.f32.mrf.mxu1 }
 0x1e3   :  { %1029 = shalt.err (!%p1026_p9)
}
 0x1e4   :  { %752 = dma.vmem_to_hbm [thread:$0]  %s750_s2, 128, %s1133_s5, [#allocation4]  }
 0x1e5   :  { %1040 = dma.done.wait [#allocation4], 128  }
 0x1e6   :  { %1041 = vsyncadd [#allocation4], 4294967168 }
 0x1e7   :  { %756 = vsyncpa [#allocation3], 1 }
 0x1e8   :  { %757 = vsyncpa [#allocation4], 1 }

// kernel: tpu_custom_call.1
= control target key start
LH: loop header
LB: loop body
LE: loop exit
PB: predicated region body
PF: predicated region fallthrough
CT: control target
= control target key end

     0   :  { %10 = vsyncpa [#allocation3], 0  ;;  %s1128_s0 = inlined_call_operand.vmem [shape: bf16[8,784], index: 0, kind: input, shape index: {}]   ;;  %s1129_s1 = inlined_call_operand.hbm [shape: bf16[784,128], index: 1, kind: input, shape index: {}]   ;;  %s1130_s2 = inlined_call_operand.vmem [shape: f32[1,128], index: 2, kind: input, shape index: {}]   ;;  %s1131_s3 = inlined_call_operand.vmem [shape: bf16[128,64], index: 3, kind: input, shape index: {}]   ;;  %s1132_s4 = inlined_call_operand.vmem [shape: f32[1,64], index: 4, kind: input, shape index: {}]   ;;  %s1133_s5 = inlined_call_operand.hbm [shape: f32[8,64], index: 5, kind: output, shape index: {}]  }
   0x1   :  { %11 = vsyncpa [#allocation4], 0  ;;  %s1042_s18 = smov [#allocation2]  }
   0x2   :  { %s19_s19 = sshll.u32 %s1042_s18, 4  ;;  %s20_s19 = int_to_ptr.vmem [resolvable:$true] %s19_s19 }
   0x3   :  { %s1006_s20 = scalar_lea.vmem %s20_s19, 6272  ;;  %p1011_p1 = scmp.lt.s32.totalorder %s20_s19, %s20_s19 }
   0x4   :  { %p1007_p0 = scmp.ne.s32.totalorder %s20_s19, %s1006_s20  ;;  %p1012_p2 = scmp.lt.s32.totalorder %s1006_s20, %s1006_s20 }
   0x6   :  { %p1013_p3 = por %p1012_p2, %p1011_p1 }
   0x8   :  { %p1014_p4 = pnand %p1013_p3, %p1007_p0 }
   0xa   :  { %1017 = shalt.err (!%p1014_p4)
}
   0xb   :  { %s1043_s21 = smov 64   ;;  %s1044_s22 = smov 4  }
   0xc   :  { %25 = dma.hbm_to_vmem [thread:$0]  %s1129_s1, 6272, %s20_s19, [#allocation3], %s1043_s21, %s1043_s21, %s1044_s22  }
   0xd   :  { %1038 = dma.done.wait [#allocation3], 6272  }
   0xe   :  { %1039 = vsyncadd [#allocation3], 4294961024  ;;  %v934_v0 = vld [vmem:[#allocation2 + $0x78] sm:$0xff]   ;;  %v938_v4 = vld [vmem:[#allocation2 + $0x70] sm:$0xff]   ;;  %v1045_v43 = vmov 0.0   ;;  %vm1046_vm0 = vmmov 0  }
   0xf   :  { %v935_v1 = vld [vmem:[#allocation2 + $0x38] sm:$0xff]   ;;  %825 = vmatprep.subr.bf16.mxu0 %v934_v0  ;;  %v939_v5 = vld [vmem:[#allocation2 + $0x30] sm:$0xff]   ;;  %v942_v8 = vld [vmem:[#allocation2 + $0x68] sm:$0xff]   ;;  %vm463_vm1 = vcmask 130048   ;;  %s1047_s1 = smov [#allocation5]   ;;  %vm741_vm2 = vcmask 523264  }
  0x10   :  { %v936_v2 = vld [vmem:[#allocation2 + $0xf8] sm:$0xff]   ;;  %826 = vmatpush3.bf16.msra.mxu0 %v935_v1  ;;  %v940_v6 = vld [vmem:[#allocation2 + $0xf0] sm:$0xff]   ;;  %v943_v9 = vld [vmem:[#allocation2 + $0x28] sm:$0xff]  }
  0x11   :  { %v937_v3 = vld [vmem:[#allocation2 + $0xb8] sm:$0xff]   ;;  %847 = vmatprep.subr.bf16.mxu1 %v936_v2  ;;  %827 = vmatprep.subr.bf16.mxu0 %v938_v4  ;;  %v941_v7 = vld [vmem:[#allocation2 + $0xb0] sm:$0xff]   ;;  %v944_v10 = vld [vmem:[#allocation2 + $0xe8] sm:$0xff]  }
  0x12   :  { %848 = vmatpush3.bf16.msra.mxu1 %v937_v3  ;;  %v945_v11 = vld [vmem:[#allocation2 + $0xa8] sm:$0xff]   ;;  %v946_v12 = vld [vmem:[#allocation2 + $0x60] sm:$0xff]   ;;  %v950_v16 = vld [vmem:[#allocation2 + $0x58] sm:$0xff]  }
  0x13   :  { %849 = vmatprep.subr.bf16.mxu1 %v940_v6  ;;  %v947_v13 = vld [vmem:[#allocation2 + $0x20] sm:$0xff]   ;;  %v951_v17 = vld [vmem:[#allocation2 + $0x18] sm:$0xff]   ;;  %v954_v20 = vld [vmem:[#allocation2 + $0x50] sm:$0xff]  }
  0x14   :  { %828 = vmatpush3.bf16.msra.mxu0 %v939_v5  ;;  %v948_v14 = vld [vmem:[#allocation2 + $0xe0] sm:$0xff]   ;;  %v952_v18 = vld [vmem:[#allocation2 + $0xd8] sm:$0xff]   ;;  %v955_v21 = vld [vmem:[#allocation2 + $0x10] sm:$0xff]  }
  0x15   :  { %829 = vmatprep.subr.bf16.mxu0 %v942_v8  ;;  %v949_v15 = vld [vmem:[#allocation2 + $0xa0] sm:$0xff]   ;;  %v953_v19 = vld [vmem:[#allocation2 + $0x98] sm:$0xff]   ;;  %v956_v22 = vld [vmem:[#allocation2 + $0xd0] sm:$0xff]  }
  0x16   :  { %850 = vmatpush3.bf16.msra.mxu1 %v941_v7  ;;  %v957_v23 = vld [vmem:[#allocation2 + $0x90] sm:$0xff]   ;;  %v958_v24 = vld [vmem:[#allocation2 + $0x48] sm:$0xff]   ;;  %v962_v28 = vld [vmem:[#allocation2 + $0x40] sm:$0xff]  }
  0x17   :  { %851 = vmatprep.subr.bf16.mxu1 %v944_v10  ;;  %v959_v25 = vld [vmem:[#allocation2 + $0x8] sm:$0xff]   ;;  %v963_v29 = vld [vmem:[#allocation2] sm:$0xff]   ;;  %v968_v35 = vld [vmem:[#allocation2 + $0x178] sm:$0xff]  }
  0x18   :  { %830 = vmatpush3.bf16.msra.mxu0 %v943_v9  ;;  %v960_v26 = vld [vmem:[#allocation2 + $0xc8] sm:$0xff]   ;;  %v964_v30 = vld [vmem:[#allocation2 + $0xc0] sm:$0xff]   ;;  %v971_v39 = vld [vmem:[#allocation2 + $0x138] sm:$0xff]  }
  0x19   :  { %831 = vmatprep.subr.bf16.mxu0 %v946_v12  ;;  %v961_v27 = vld [vmem:[#allocation2 + $0x88] sm:$0xff]   ;;  %v36_v31 = vld [vmem:[%s1128_s0] sm:$0xff]  ;;  %v972_v40 = vld [vmem:[#allocation2 + $0x170] sm:$0xff]  }
  0x1a   :  { %852 = vmatpush3.bf16.msra.mxu1 %v945_v11  ;;  %v759_v32 = vcombine.low %v36_v31, %v36_v31  ;;  %v760_v33 = vcombine.high %v36_v31, %v36_v31  ;;  %v967_v34 = vld [vmem:[#allocation2 + $0x80] sm:$0xff]   ;;  %v37_v36 = vld [vmem:[%s1128_s0 + $0x8] sm:$0xff]  ;;  %v973_v41 = vld [vmem:[#allocation2 + $0x130] sm:$0xff]  }
  0x1b   :  { %853 = vmatprep.subr.bf16.mxu1 %v948_v14  ;;  %v761_v37 = vcombine.low %v37_v36, %v37_v36  ;;  %v762_v38 = vcombine.high %v37_v36, %v37_v36  ;;  %v974_v42 = vld [vmem:[#allocation2 + $0x168] sm:$0xff]   ;;  %v976_v45 = vld [vmem:[#allocation2 + $0x160] sm:$0xff]   ;;  %v978_v47 = vld [vmem:[#allocation2 + $0x158] sm:$0xff]  }
  0x1c   :  { %832 = vmatpush3.bf16.msra.mxu0 %v947_v13  ;;  %499 = vmatprep.mubr.bf16.mxu0 %v760_v33  ;;  %v975_v44 = vld [vmem:[#allocation2 + $0x128] sm:$0xff]   ;;  %v977_v46 = vld [vmem:[#allocation2 + $0x120] sm:$0xff]   ;;  %v979_v48 = vld [vmem:[#allocation2 + $0x118] sm:$0xff]  }
  0x1d   :  { %833 = vmatprep.subr.bf16.mxu0 %v950_v16  ;;  %539 = vmatprep.mubr.bf16.mxu1 %v762_v38  ;;  %v980_v49 = vld [vmem:[#allocation2 + $0x150] sm:$0xff]   ;;  %v986_v50 = vld [vmem:[#allocation2 + $0x180] sm:$0xff]   ;;  %v989_v54 = vld [vmem:[%s1128_s0 + $0x18] ss:$0 sps:$4 sm:$0xff]  }
  0x1e   :  { %854 = vmatpush3.bf16.msra.mxu1 %v949_v15  ;;  %v38_v51 = vld [vmem:[%s1128_s0 + $0x10] sm:$0xff]  ;;  %v982_v55 = vld [vmem:[#allocation2 + $0x148] sm:$0xff]   ;;  %v984_v57 = vld [vmem:[#allocation2 + $0x140] sm:$0xff]  }
  0x1f   :  { %855 = vmatprep.subr.bf16.mxu1 %v952_v18  ;;  %v981_v52 = vld [vmem:[#allocation2 + $0x110] sm:$0xff]   ;;  %v764_v53 = vcombine.high %v38_v51, %v38_v51  ;;  %v983_v56 = vld [vmem:[#allocation2 + $0x108] sm:$0xff]   ;;  %v985_v58 = vld [vmem:[#allocation2 + $0x100] sm:$0xff]   ;;  %v763_v59 = vcombine.low %v38_v51, %v38_v51 }
  0x20   :  { %834 = vmatpush3.bf16.msra.mxu0 %v951_v17  ;;  %v990_v60 = vld [vmem:[%s1131_s3 + $0x38] sm:$0xff]   ;;  %v991_v61 = vld [vmem:[%s1131_s3 + $0x30] sm:$0xff]   ;;  %v992_v62 = vld [vmem:[%s1131_s3 + $0x28] sm:$0xff]  }
  0x21   :  { %835 = vmatprep.subr.bf16.mxu0 %v954_v20  ;;  %v993_v63 = vld [vmem:[%s1131_s3 + $0x20] sm:$0xff]   ;;  %v994_v0 = vld [vmem:[%s1131_s3 + $0x18] sm:$0xff]   ;;  %v995_v1 = vld [vmem:[%s1131_s3 + $0x10] sm:$0xff]  }
  0x22   :  { %856 = vmatpush3.bf16.msra.mxu1 %v953_v19  ;;  %v996_v2 = vld [vmem:[%s1131_s3 + $0x8] sm:$0xff]   ;;  %v997_v3 = vld [vmem:[%s1131_s3] sm:$0xff]  }
  0x23   :  { %857 = vmatprep.subr.bf16.mxu1 %v956_v22  ;;  %v758_v17 = vld [vmem:[%s1130_s2] ss:$0 sm:$0xff]  ;;  %s749_s2 = sshll.u32 %s1047_s1, 4  ;;  %s750_s2 = int_to_ptr.vmem [resolvable:$true] %s749_s2 }
  0x24   :  { %836 = vmatpush3.bf16.msra.mxu0 %v955_v21  ;;  %s1018_s25 = scalar_lea.vmem %s750_s2, 128  ;;  %p1023_p6 = scmp.lt.s32.totalorder %s750_s2, %s750_s2 }
  0x25   :  { %837 = vmatprep.subr.bf16.mxu0 %v958_v24  ;;  %p1019_p5 = scmp.ne.s32.totalorder %s750_s2, %s1018_s25  ;;  %p1024_p7 = scmp.lt.s32.totalorder %s1018_s25, %s1018_s25 }
  0x26   :  { %858 = vmatpush3.bf16.msra.mxu1 %v957_v23 }
  0x27   :  { %859 = vmatprep.subr.bf16.mxu1 %v960_v26  ;;  %p1025_p8 = por %p1024_p7, %p1023_p6 }
  0x28   :  { %838 = vmatpush3.bf16.msra.mxu0 %v959_v25 }
  0x29   :  { %839 = vmatprep.subr.bf16.mxu0 %v962_v28  ;;  %p1026_p9 = pnand %p1025_p8, %p1019_p5 }
  0x2a   :  { %860 = vmatpush3.bf16.msra.mxu1 %v961_v27 }
  0x2b   :  { %861 = vmatprep.subr.bf16.mxu1 %v964_v30  ;;  %v816_v30 = vld [vmem:[%s1132_s4] ss:$0 sm:$0xff] }
  0x2c   :  { %840 = vmatpush3.bf16.msra.mxu0 %v963_v29 }
  0x2d   :  { %869 = vmatprep.subr.bf16.mxu0 %v968_v35 }
  0x2e   :  { %862 = vmatpush3.bf16.msra.mxu1 %v967_v34 }
  0x2f   :  { %500 = vmatmul.mubr.bf16.vlgmr.msra.gmra.mxu0 %v759_v32  ;;  %902 = vmatprep.subr.bf16.mxu1 %v1045_v43 }
  0x30   :  { %870 = vmatpush3.bf16.msra.mxu0 %v971_v39  ;;  %579 = vmatprep.mubr.bf16.mxu0 %v764_v53 }
  0x31   :  { %540 = vmatmul.mubr.bf16.vlgmr.msra.gmra.mxu1 %v761_v37  ;;  %871 = vmatprep.subr.bf16.mxu0 %v972_v40 }
  0x32   :  { %904 = vmatprep.mubr.msk.bf16.mxu1 %vm1046_vm0, %v1045_v43  ;;  %903 = vmatpush3.bf16.msra.mxu1 %v986_v50 }
  0x33   :  { %908 = vmatprep.subr.bf16.mxu1 %v1045_v43 }
  0x34   :  { %872 = vmatpush3.bf16.msra.mxu0 %v973_v41 }
  0x35   :  { %873 = vmatprep.subr.bf16.mxu0 %v974_v42 }
  0x38   :  { %874 = vmatpush3.bf16.msra.mxu0 %v975_v44 }
  0x39   :  { %875 = vmatprep.subr.bf16.mxu0 %v976_v45  ;;  %905 = vmatmul.mubr.msk.bf16.vlgmr.msra.gmra.mxu1 %vm463_vm1, %v989_v54 }
  0x3a   :  { %924 = vmatprep.mubr.msk.bf16.mxu1 %vm1046_vm0, %v1045_v43  ;;  %909 = vmatpush3.bf16.msra.mxu1 %v990_v60 }
  0x3b   :  { %910 = vmatprep.subr.bf16.mxu1 %v1045_v43 }
  0x3c   :  { %876 = vmatpush3.bf16.msra.mxu0 %v977_v46 }
  0x3d   :  { %877 = vmatprep.subr.bf16.mxu0 %v978_v47 }
  0x3e   :  { %911 = vmatpush3.bf16.msra.mxu1 %v991_v61 }
  0x3f   :  { %912 = vmatprep.subr.bf16.mxu1 %v1045_v43 }
  0x40   :  { %878 = vmatpush3.bf16.msra.mxu0 %v979_v48 }
  0x41   :  { %879 = vmatprep.subr.bf16.mxu0 %v980_v49 }
  0x42   :  { %913 = vmatpush3.bf16.msra.mxu1 %v992_v62 }
  0x43   :  { %914 = vmatprep.subr.bf16.mxu1 %v1045_v43 }
  0x44   :  { %880 = vmatpush3.bf16.msra.mxu0 %v981_v52 }
  0x45   :  { %881 = vmatprep.subr.bf16.mxu0 %v982_v55 }
  0x46   :  { %915 = vmatpush3.bf16.msra.mxu1 %v993_v63 }
  0x47   :  { %916 = vmatprep.subr.bf16.mxu1 %v1045_v43 }
  0x48   :  { %882 = vmatpush3.bf16.msra.mxu0 %v983_v56 }
  0x49   :  { %883 = vmatprep.subr.bf16.mxu0 %v984_v57 }
  0x4a   :  { %917 = vmatpush3.bf16.msra.mxu1 %v994_v0 }
  0x4b   :  { %918 = vmatprep.subr.bf16.mxu1 %v1045_v43 }
  0x4c   :  { %884 = vmatpush3.bf16.msra.mxu0 %v985_v58 }
  0x4e   :  { %919 = vmatpush3.bf16.msra.mxu1 %v995_v1 }
  0x4f   :  { %580 = vmatmul.mubr.bf16.vlgmr.msra.gmra.mxu0 %v763_v59  ;;  %920 = vmatprep.subr.bf16.mxu1 %v1045_v43 }
  0x52   :  { %921 = vmatpush3.bf16.msra.mxu1 %v996_v2 }
  0x53   :  { %922 = vmatprep.subr.bf16.mxu1 %v1045_v43 }
  0x56   :  { %923 = vmatpush3.bf16.msra.mxu1 %v997_v3 }
  0xef   :  { %v841_v4 = vpop.f32.mrf.mxu0 }
  0xf1   :  { %v842_v5 = vpop.f32.mrf.mxu0  ;;  %v863_v6 = vpop.f32.mrf.mxu1 }
  0xf2   :  { %v843_v16 = vadd.f32 %v842_v5, %v841_v4 }
  0xf3   :  { %v844_v7 = vpop.f32.mrf.mxu0  ;;  %v864_v8 = vpop.f32.mrf.mxu1 }
  0xf4   :  { %v502_v18 = vadd.f32 %v843_v16, %v758_v17  ;;  %v865_v19 = vadd.f32 %v864_v8, %v863_v6 }
  0xf5   :  { %v845_v9 = vpop.f32.mrf.mxu0  ;;  %v866_v10 = vpop.f32.mrf.mxu1 }
  0xf6   :  { %v542_v22 = vadd.f32 %v865_v19, %v502_v18 }
  0xf7   :  { %v867_v11 = vpop.f32.mrf.mxu1 }
  0xf9   :  { %v621_v12 = vpop.f32.mrf.mxu1 }
  0xfb   :  { %v906_v13 = vpop.f32.mrf.mxu1 }
  0xfd   :  { %v624_v14 = vpop.f32.mrf.mxu1 }
  0xff   :  { %v907_v15 = vpop.f32.mrf.mxu1 }
 0x10f   :  { %v885_v20 = vpop.f32.mrf.mxu0 }
 0x111   :  { %v886_v21 = vpop.f32.mrf.mxu0 }
 0x112   :  { %v887_v23 = vadd.f32 %v886_v21, %v885_v20 }
 0x113   :  { %v888_v24 = vpop.f32.mrf.mxu0 }
 0x114   :  { %v582_v25 = vadd.f32 %v887_v23, %v542_v22 }
 0x115   :  { %v889_v26 = vpop.f32.mrf.mxu0 }
 0x116   :  { %v622_v27 = vadd.f32 %v621_v12, %v582_v25 }
 0x118   :  { %v627_v28 = vmax.f32 %v622_v27, 0.0 }
 0x11a   :  { %v628_v29 = vpack.c.bf16 %v627_v28, %v627_v28 }
 0x11c   :  { %925 = vmatmul.mubr.bf16.vlgmr.msra.gmra.mxu1 %v628_v29 }
 0x1dc   :  { %v734_v31 = vpop.f32.mrf.mxu1 }
 0x1dd   :  { %v735_v32 = vadd.f32 %v816_v30, %v734_v31 }
 0x1de   :  { %v926_v33 = vpop.f32.mrf.mxu1 }
 0x1df   :  { %v740_v34 = vmax.f32 %v735_v32, 0.0 }
 0x1e0   :  { %v737_v35 = vpop.f32.mrf.mxu1 }
 0x1e1   :  { %742 = vst.msk [vmem:[#allocation5] sm:$0xff] %vm741_vm2, %v740_v34 }
 0x1e2   :  { %v927_v36 = vpop.f32.mrf.mxu1 }
 0x1e3   :  { %1029 = shalt.err (!%p1026_p9)
}
 0x1e4   :  { %752 = dma.vmem_to_hbm [thread:$0]  %s750_s2, 128, %s1133_s5, [#allocation4]  }
 0x1e5   :  { %1040 = dma.done.wait [#allocation4], 128  }
 0x1e6   :  { %1041 = vsyncadd [#allocation4], 4294967168 }
 0x1e7   :  { %756 = vsyncpa [#allocation3], 1 }
 0x1e8   :  { %757 = vsyncpa [#allocation4], 1 }

</bundles_post_ra>
